<compile_context>
chip_gen: v7x
topology: tpu7x:2x2x1
jax: 0.10.0
libtpu: 0.0.40
codegen_flags: <defaults>
</compile_context>

<pallas_src>
import functools

import jax
import jax.numpy as jnp
from jax.experimental import pallas as pl
from jax.experimental.pallas import tpu as pltpu

IN_FEATURES = 10
OUT_FEATURES = 10


def _round_up(n, m):
    return ((n + m - 1) // m) * m


def _linear_xent_kernel(x_ref, w_ref, b_ref, t_ref, fc_ref, nll_ref):
    x = x_ref[...]            # (tb, IN)   float32
    w = w_ref[...]            # (OUT, IN)  float32  (PyTorch layout, no pre-transpose)
    b = b_ref[...]            # (1, OUT)   float32
    tgt = t_ref[...]          # (tb, 1)    int32

    # Linear layer on the MXU: contract x's dim 1 with w's dim 1 -> (tb, OUT).
    logits = jax.lax.dot_general(
        x, w,
        dimension_numbers=(((1,), (1,)), ((), ())),
        preferred_element_type=jnp.float32) + b
    fc_ref[...] = logits.astype(fc_ref.dtype)

    # Cross-entropy per row without forming the full log-softmax tile:
    #   nll = (max + log(sum(exp(logits - max)))) - logits[target]
    m = jnp.max(logits, axis=-1, keepdims=True)                       # (tb, 1)
    lse = jnp.log(jnp.sum(jnp.exp(logits - m), axis=-1, keepdims=True))
    cls = jax.lax.broadcasted_iota(jnp.int32, logits.shape, 1)        # (tb, OUT)
    picked = jnp.sum(jnp.where(cls == tgt, logits, 0.0),
                     axis=-1, keepdims=True)                          # (tb, 1)
    nll_ref[...] = (m + lse) - picked
    # Rows past B in an edge block hold undefined data, but Pallas masks their
    # output stores and the wrapper only sums the B real rows, so no in-kernel
    # masking is needed (garbage rows never mix with valid rows).


@functools.partial(jax.jit, static_argnames=("tb",))
def example_model_with_loss(x, target, weight, bias, tb=2048):
    """Training-mode forward: returns (fc, loss).

    x:      (B, IN)   float32
    target: (B,)      int32 class indices in [0, OUT)
    weight: (OUT, IN) float32  (PyTorch nn.Linear layout)
    bias:   (OUT,)    float32
    """
    B = x.shape[0]
    # Batch tile: always a multiple of 8 sublanes, never larger than needed.
    tb = max(8, min(_round_up(tb, 8), _round_up(B, 8)))
    num_tiles = pl.cdiv(B, tb)

    x = x.astype(jnp.float32)
    w = weight.astype(jnp.float32)                          # stays [OUT, IN]
    b2d = bias.reshape(1, OUT_FEATURES).astype(jnp.float32)
    t2d = target.reshape(B, 1).astype(jnp.int32)

    fc, nll = pl.pallas_call(
        _linear_xent_kernel,
        out_shape=(
            jax.ShapeDtypeStruct((B, OUT_FEATURES), jnp.float32),
            jax.ShapeDtypeStruct((B, 1), jnp.float32),
        ),
        grid=(num_tiles,),
        in_specs=[
            pl.BlockSpec((tb, IN_FEATURES), lambda i: (i, 0)),            # x tile
            pl.BlockSpec((OUT_FEATURES, IN_FEATURES), lambda i: (0, 0)),  # weight (resident)
            pl.BlockSpec((1, OUT_FEATURES), lambda i: (0, 0)),            # bias (resident)
            pl.BlockSpec((tb, 1), lambda i: (i, 0)),                      # target tile
        ],
        out_specs=(
            pl.BlockSpec((tb, OUT_FEATURES), lambda i: (i, 0)),           # fc tile
            pl.BlockSpec((tb, 1), lambda i: (i, 0)),                      # per-row NLL
        ),
        compiler_params=pltpu.CompilerParams(
            # Every output block is written exactly once per step, so the
            # batch axis is parallel (megacore-shardable on v7x).
            dimension_semantics=("parallel",)),
    )(x, w, b2d, t2d)

    # Tiny final reduction + exact mean division in the wrapper.
    loss = jnp.sum(nll) / B
    return fc, loss


def _reference(x, target, weight, bias):
    fc = x @ weight.T + bias
    logp = jax.nn.log_softmax(fc, axis=-1)
    loss = -jnp.mean(logp[jnp.arange(x.shape[0]), target])
    return fc, loss


if __name__ == "__main__":
    key = jax.random.PRNGKey(0)
    kx, kw, kb, kt, kx2, kt2 = jax.random.split(key, 6)

    # Deterministic parameter init (mimics nn.Linear's uniform(-1/sqrt(in), 1/sqrt(in))).
    bound = 1.0 / (IN_FEATURES ** 0.5)
    weight = jax.random.uniform(kw, (OUT_FEATURES, IN_FEATURES),
                                minval=-bound, maxval=bound, dtype=jnp.float32)
    bias = jax.random.uniform(kb, (OUT_FEATURES,),
                              minval=-bound, maxval=bound, dtype=jnp.float32)

    # Case 1: B=16 with tb=8 -> 2 full grid steps.
    B1 = 16
    x1 = jax.random.normal(kx, (B1, IN_FEATURES), dtype=jnp.float32)
    t1 = jax.random.randint(kt, (B1,), 0, OUT_FEATURES, dtype=jnp.int32)
    fc1, loss1 = example_model_with_loss(x1, t1, weight, bias, tb=8)
    jax.block_until_ready((fc1, loss1))
    fc1_ref, loss1_ref = _reference(x1, t1, weight, bias)
    assert jnp.allclose(fc1, fc1_ref, atol=1e-5), "fc mismatch (B=16)"
    assert jnp.allclose(loss1, loss1_ref, atol=1e-5), "loss mismatch (B=16)"

    # Case 2: B=13 with tb=8 -> exercises the masked edge-block path.
    B2 = 13
    x2 = jax.random.normal(kx2, (B2, IN_FEATURES), dtype=jnp.float32)
    t2 = jax.random.randint(kt2, (B2,), 0, OUT_FEATURES, dtype=jnp.int32)
    fc2, loss2 = example_model_with_loss(x2, t2, weight, bias, tb=8)
    jax.block_until_ready((fc2, loss2))
    fc2_ref, loss2_ref = _reference(x2, t2, weight, bias)
    assert fc2.shape == (B2, OUT_FEATURES)
    assert jnp.allclose(fc2, fc2_ref, atol=1e-5), "fc mismatch (B=13)"
    assert jnp.allclose(loss2, loss2_ref, atol=1e-5), "loss mismatch (B=13)"

    # Case 3: default tb path (tb clamps to round_up(B, 8) -> single grid step).
    fc3, loss3 = example_model_with_loss(x2, t2, weight, bias)
    jax.block_until_ready((fc3, loss3))
    assert jnp.allclose(fc3, fc2_ref, atol=1e-5), "fc mismatch (default tb)"
    assert jnp.allclose(loss3, loss2_ref, atol=1e-5), "loss mismatch (default tb)"

    print("KERNEL_OK")
</pallas_src>

<mosaic_0001>
module attributes {stable_mosaic.version = 11 : i64} {
  func.func @_linear_xent_kernel(%arg0: i32, %arg1: memref<8x10xf32, #tpu.memory_space<vmem>>, %arg2: memref<10x10xf32, #tpu.memory_space<vmem>>, %arg3: memref<1x10xf32, #tpu.memory_space<vmem>>, %arg4: memref<8x1xi32, #tpu.memory_space<vmem>>, %arg5: memref<8x10xf32, #tpu.memory_space<vmem>>, %arg6: memref<8x1xf32, #tpu.memory_space<vmem>>) attributes {dimension_semantics = [#tpu.dimension_semantics<parallel>], iteration_bounds = array<i64: 2>, scalar_prefetch = 0 : i64, scratch_operands = 0 : i64, tpu.core_type = #tpu.core_type<tc>, window_params = [{transform_indices = @transform_0, window_bounds = array<i64: 8, 10>}, {pipeline_mode = #tpu.pipeline_mode<synchronous>, transform_indices = @transform_1, window_bounds = array<i64: 10, 10>}, {pipeline_mode = #tpu.pipeline_mode<synchronous>, transform_indices = @transform_2, window_bounds = array<i64: 1, 10>}, {transform_indices = @transform_3, window_bounds = array<i64: 8, 1>}, {transform_indices = @transform_4, window_bounds = array<i64: 8, 10>}, {transform_indices = @transform_5, window_bounds = array<i64: 8, 1>}]} {
    %c0 = arith.constant 0 : index
    %c0_0 = arith.constant 0 : index
    %0 = vector.load %arg1[%c0, %c0_0] : memref<8x10xf32, #tpu.memory_space<vmem>>, vector<8x10xf32>
    %c0_1 = arith.constant 0 : index
    %c0_2 = arith.constant 0 : index
    %1 = vector.load %arg2[%c0_1, %c0_2] : memref<10x10xf32, #tpu.memory_space<vmem>>, vector<10x10xf32>
    %c0_3 = arith.constant 0 : index
    %c0_4 = arith.constant 0 : index
    %2 = vector.load %arg3[%c0_3, %c0_4] : memref<1x10xf32, #tpu.memory_space<vmem>>, vector<1x10xf32>
    %c0_5 = arith.constant 0 : index
    %c0_6 = arith.constant 0 : index
    %3 = vector.load %arg4[%c0_5, %c0_6] : memref<8x1xi32, #tpu.memory_space<vmem>>, vector<8x1xi32>
    %cst = arith.constant dense<0.000000e+00> : vector<8x10xf32>
    %4 = tpu.matmul %0, %1, %cst {dimension_numbers = #tpu.dot_dimension_numbers<[1], [1], [0], [0], [0, 0, 1, 0], [], []>} : vector<8x10xf32>, vector<10x10xf32>, vector<8x10xf32> -> vector<8x10xf32>
    %5 = vector.broadcast %2 : vector<1x10xf32> to vector<8x10xf32>
    %6 = arith.addf %4, %5 : vector<8x10xf32>
    %c0_7 = arith.constant 0 : index
    %c0_8 = arith.constant 0 : index
    %7 = vector.load %arg5[%c0_7, %c0_8] : memref<8x10xf32, #tpu.memory_space<vmem>>, vector<8x10xf32>
    tpu.vector_store %arg5[%c0_7, %c0_8], %6 {strides = array<i32>} : memref<8x10xf32, #tpu.memory_space<vmem>>, vector<8x10xf32>,
    %cst_9 = arith.constant dense<0xFF800000> : vector<8xf32>
    %8 = vector.multi_reduction <maximumf>, %6, %cst_9 [1] : vector<8x10xf32> to vector<8xf32>
    %9 = vector.shape_cast %8 : vector<8xf32> to vector<8x1xf32>
    %10 = vector.broadcast %9 : vector<8x1xf32> to vector<8x10xf32>
    %11 = arith.subf %6, %10 : vector<8x10xf32>
    %12 = math.exp %11 : vector<8x10xf32>
    %cst_10 = arith.constant dense<0.000000e+00> : vector<8xf32>
    %13 = vector.multi_reduction <add>, %12, %cst_10 [1] : vector<8x10xf32> to vector<8xf32>
    %14 = vector.shape_cast %13 : vector<8xf32> to vector<8x1xf32>
    %15 = math.log %14 : vector<8x1xf32>
    %16 = tpu.iota {dimensions = array<i32: 1>} : vector<8x10xi32>
    %17 = vector.broadcast %3 : vector<8x1xi32> to vector<8x10xi32>
    %18 = arith.cmpi eq, %16, %17 : vector<8x10xi32>
    %cst_11 = arith.constant 0.000000e+00 : f32
    %19 = vector.broadcast %cst_11 : f32 to vector<8x10xf32>
    %20 = arith.select %18, %6, %19 : vector<8x10xi1>, vector<8x10xf32>
    %cst_12 = arith.constant dense<0.000000e+00> : vector<8xf32>
    %21 = vector.multi_reduction <add>, %20, %cst_12 [1] : vector<8x10xf32> to vector<8xf32>
    %22 = vector.shape_cast %21 : vector<8xf32> to vector<8x1xf32>
    %23 = arith.addf %9, %15 : vector<8x1xf32>
    %24 = arith.subf %23, %22 : vector<8x1xf32>
    %c0_13 = arith.constant 0 : index
    %c0_14 = arith.constant 0 : index
    %25 = vector.load %arg6[%c0_13, %c0_14] : memref<8x1xf32, #tpu.memory_space<vmem>>, vector<8x1xf32>
    tpu.vector_store %arg6[%c0_13, %c0_14], %24 {strides = array<i32>} : memref<8x1xf32, #tpu.memory_space<vmem>>, vector<8x1xf32>,
    return
  }
  func.func @transform_0(%arg0: i32) -> (i32, i32) {
    %c0_i32 = arith.constant 0 : i32
    %c0_i32_0 = arith.constant 0 : i32
    return %arg0, %c0_i32 : i32, i32
  }
  func.func @transform_1(%arg0: i32) -> (i32, i32) {
    %c0_i32 = arith.constant 0 : i32
    %c0_i32_0 = arith.constant 0 : i32
    %c0_i32_1 = arith.constant 0 : i32
    return %c0_i32, %c0_i32_0 : i32, i32
  }
  func.func @transform_2(%arg0: i32) -> (i32, i32) {
    %c0_i32 = arith.constant 0 : i32
    %c0_i32_0 = arith.constant 0 : i32
    %c0_i32_1 = arith.constant 0 : i32
    return %c0_i32, %c0_i32_0 : i32, i32
  }
  func.func @transform_3(%arg0: i32) -> (i32, i32) {
    %c0_i32 = arith.constant 0 : i32
    %c0_i32_0 = arith.constant 0 : i32
    return %arg0, %c0_i32 : i32, i32
  }
  func.func @transform_4(%arg0: i32) -> (i32, i32) {
    %c0_i32 = arith.constant 0 : i32
    %c0_i32_0 = arith.constant 0 : i32
    return %arg0, %c0_i32 : i32, i32
  }
  func.func @transform_5(%arg0: i32) -> (i32, i32) {
    %c0_i32 = arith.constant 0 : i32
    %c0_i32_0 = arith.constant 0 : i32
    return %arg0, %c0_i32 : i32, i32
  }
}

</mosaic_0001>

<bundles_post_ra>
// kernel: example_model_with_loss.1
= control target key start
LH: loop header
LB: loop body
LE: loop exit
PB: predicated region body
PF: predicated region fallthrough
CT: control target
= control target key end

     0   :  { %11 = vsyncpa [#allocation3], 0  ;;  %s783_s0 = inlined_call_operand.vmem [shape: f32[16,10], index: 0, kind: input, shape index: {}]   ;;  %s784_s1 = inlined_call_operand.vmem [shape: f32[10,10], index: 1, kind: input, shape index: {}]   ;;  %s785_s2 = inlined_call_operand.vmem [shape: f32[1,10], index: 2, kind: input, shape index: {}]   ;;  %s786_s3 = inlined_call_operand.vmem [shape: s32[16,1], index: 3, kind: input, shape index: {}]   ;;  %s787_s4 = inlined_call_operand.hbm [shape: f32[16,10], index: 4, kind: output, shape index: {0}]   ;;  %s788_s5 = inlined_call_operand.vmem [shape: f32[16,1], index: 5, kind: output, shape index: {1}]  }
   0x1   :  { %13 = vsyncpa [#allocation3 + $0x1], 0  ;;  %s658_s18 = smov 0   ;;  %s660_s19 = smov 0  }
   0x2   :  { %s662_s20 = smov 0   ;;  %s664_s21 = smov 0  }
   0x3 LB: > { %s679_s22 = sadd.s32 4294967295, %s621_s21   ;;  %s481_s23 = sadd.s32 4294967294, %s621_s21   ;;  %s621_s21 = sphi %s664_s21, %s794_s21   ;;  %s617_s20 = sphi %s662_s20, %s793_s20   ;;  %s613_s19 = sphi %s660_s19, %s792_s19   ;;  %s609_s18 = sphi %s658_s18, %s791_s18  }
   0x4   : > { %s683_s24 = sadd.s32 1, %s621_s21   ;;  %s120_s25 = sadd.s32 1, %s617_s20 }
   0x5   : > { %s117_s26 = ssub.s32 %s621_s21, %s683_s24  ;;  %p130_p0 = scmp.ne.s32.totalorder %s617_s20, %s613_s19 }
   0x6   : > { %p118_p1 = scmp.eq.s32.totalorder %s117_s26, 0  ;;  %p131_p2 = scmp.eq.s32.totalorder %s679_s22, 1 }
   0x7   : > { %p136_p3 = scmp.ne.s32.totalorder %s613_s19, %s609_s18  ;;  %p137_p4 = scmp.eq.s32.totalorder %s481_s23, 1 }
   0x8   : > { %s694_s27 = scalar_select %p118_p1, %s617_s20, %s120_s25  }
   0x9   : > { %p696_p5 = por %p131_p2, %p130_p0  ;;  %p700_p6 = por %p137_p4, %p136_p3 }
   0xa   : > { %p484_p7 = scmp.ge.s32.totalorder %s621_s21, 1  ;;  %p201_p8 = scmp.lt.s32.totalorder %s621_s21, 3 }
   0xc   : > { %p202_p9 = pnand %p484_p7, %p201_p8 }
   0xd   : > { %v249_v0 = vld [vmem:[%s784_s1] sm:$0xff] (!%p202_p9)  ;;  %v250_v1 = vld [vmem:[%s784_s1 + $0x8] sm:$0x3] (!%p202_p9)  ;;  %vm259_vm0 = vcmask (!%p202_p9), 80896   ;;  %v623_v2 = vmov (!%p202_p9), 0.0|0.0   ;;  %p236_p10 = scmp.lt.s32.totalorder (!%p202_p9), %s679_s22, 1  ;;  %v351_v16 = vlaneseq (!%p202_p9) }
   0xe   : > { %205 = sbr.rel (%p202_p9) target bundleno = 559 (0x22f), region = 36  ;;  %507 = vmatprep.subr.bf16.mxu0 (!%p202_p9), %v623_v2  ;;  %v508_v3 = vpack.c.bf16 (!%p202_p9), %v250_v1, %v249_v0  ;;  %vm509_vm1 = vmpackc.low (!%p202_p9), %vm259_vm0, %vm259_vm0  ;;  %vm624_vm2 = vmmov (!%p202_p9), 0   ;;  %v625_v4 = vmov (!%p202_p9), 0.0   ;;  %v626_v6 = vmov (!%p202_p9), 0   ;;  %s227_s14 = sand.u32 (!%p202_p9), 1, %s613_s19  }
   0xf   : > { %504 = vmatprep.mubr.msk.f32.mxu0 (!%p202_p9), %vm624_vm2, %v625_v4  ;;  %554 = vset.pattern.permute.xlu0 (!%p202_p9), %v626_v6  ;;  %s485_s15 = sshll.u32 (!%p202_p9), %s227_s14, 3  ;;  %v489_v7 = vld [vmem:[%s785_s2] ss:$0 sm:$0xff] (!%p202_p9)  ;;  %v352_v17 = vand.u32 (!%p202_p9), 127, %v351_v16  ;;  %s494_s6 = sshll.u32 (!%p202_p9), %s679_s22, 7 }
  0x10   : > { %510 = vmatpush3.bf16.xpose.msk.msra.mxu0 (!%p202_p9), %vm509_vm1, %v508_v3  ;;  %s229_s23 = scalar_lea.vmem (!%p202_p9), [#allocation2], %s485_s15  ;;  %s741_s11 = scalar_lea.hbm (!%p202_p9), %s787_s4, %s494_s6 }
  0x11   : > { %s383_s7 = sshll.u32 (!%p202_p9), %s229_s23, 4  ;;  %s366_s12 = scalar_lea.sflag (!%p202_p9), [#allocation3], %s227_s14  ;;  %s384_s7 = int_to_ptr.vmem [resolvable:$true] %s383_s7 }
  0x12   : > { %s627_s15 = smov (!%p202_p9), [#allocation2]  }
  0x13   : > { %s563_s16 = sshll.u32 (!%p202_p9), %s627_s15, 4  ;;  %s564_s16 = int_to_ptr.vmem [resolvable:$false] %s563_s16 }
  0x14   : > { %s565_s17 = scalar_lea.vmem (!%p202_p9), %s564_s16, 256  ;;  %p566_p0 = scmp.lt.s32.totalorder (!%p202_p9), %s384_s7, %s564_s16 }
  0x15   : > { %s237_s9 = scalar_select %p236_p10, %s679_s22, 1 }
  0x17   : > { %s716_s10 = sshll.u32 %s237_s9, 3 }
  0x18   : > { %s239_s13 = scalar_lea.vmem %s783_s0, %s716_s10  ;;  %s243_s30 = scalar_lea.vmem %s786_s3, %s716_s10 }
  0x19   : > { %v248_v5 = vld [vmem:[%s239_s13] sm:$0xff]  ;;  %s559_s13 = scalar_lea.vmem %s384_s7, 128 }
  0x1a   : > { %505 = vmatmul.mubr.msk.f32.vlgmr.msra.gmra.mrb[0].mxu0 %vm259_vm0, %v248_v5  ;;  %v252_v12 = vld [vmem:[%s243_s30] sm:$0xff]  ;;  %p560_p11 = scmp.ne.s32.totalorder %s384_s7, %s559_s13  ;;  %p567_p1 = scmp.lt.s32.totalorder %s565_s17, %s559_s13 }
  0x1c   : > { %p561_p12 = pnand %p560_p11, %p696_p5  ;;  %p568_p2 = por %p567_p1, %p566_p0 }
  0x1e   : > { %p562_p13 = pneg %p561_p12 }
  0x20   : > { %p569_p3 = pnand %p568_p2, %p562_p13 }
  0xed   : > { %v335_v8 = vpop.f32.mrb[0].mxu0 }
  0xee   : > { %v336_v9 = vadd.f32 %v489_v7, %v335_v8  ;;  %v506_v10 = vpop.f32.mrb[1].mxu0 }
  0xf0   : > { %v340_v11 = vsel %vm259_vm0, %v336_v9, -inf  ;;  %339 = vst.msk [vmem:[%s229_s23] sm:$0xff] %vm259_vm0, %v336_v9 }
  0xf1   : > { %341 = vmax.xlane.f32.xlu0 %v340_v11 }
 0x107   : > { %354 = vperm.xlu0 %554, %v252_v12  }
 0x17e   : > { %v342_v13 = vpop.xlane.xlu0 %341 }
 0x17f   : > { %v343_v14 = vsub.f32 %v336_v9, %v342_v13 }
 0x181   : > { %v344_v15 = vmul.f32 1.442695, %v343_v14 }
 0x183   : > { %555 = vpow2.f32 %v344_v15 }
 0x186   : > { %v355_v18 = vpop.permute.xlu0 %354 }
 0x187   : > { %vm356_vm3 = vcmp.eq.s32.totalorder %v352_v17, %v355_v18 }
 0x188   : > { %v357_v21 = vsel %vm356_vm3, %v336_v9, 0.0 }
 0x189   : > { %v358_v22 = vsel %vm259_vm0, %v357_v21, 0.0 }
 0x18d   : > { %v556_v19 = vpop.eup %555 }
 0x18e   : > { %v346_v20 = vsel %vm259_vm0, %v556_v19, 0.0 }
 0x18f   : > { %347 = vadd.xlane.f32.xlu1 %v346_v20 }
 0x193   : > { %359 = vadd.xlane.f32.xlu1 %v358_v22 }
 0x194   : > { %572 = shalt.err (!%p569_p3)
}
 0x195   : > { %s573_s22 = scalar_lea.hbm %s741_s11, 128  ;;  %s577_s25 = scalar_lea.hbm %s787_s4, 256 }
 0x196   : > { %p574_p4 = scmp.ne.s32.totalorder %s741_s11, %s573_s22  ;;  %p578_p9 = scmp.lt.u32.totalorder %s741_s11, %s787_s4 }
 0x197   : > { %p579_p10 = scmp.lt.u32.totalorder %s577_s25, %s573_s22  ;;  %p581_p12 = scmp.lt.u32.totalorder %s573_s22, %s741_s11 }
 0x198   : > { %p575_p7 = pnand %p574_p4, %p696_p5 }
 0x199   : > { %p580_p11 = por %p579_p10, %p578_p9 }
 0x19a   : > { %p576_p8 = pneg %p575_p7 }
 0x19b   : > { %p582_p13 = por %p581_p12, %p580_p11 }
 0x19d   : > { %p583_p0 = pnand %p582_p13, %p576_p8 }
 0x19f   : > { %586 = shalt.err (!%p583_p0)
}
 0x1a0   : > { %511 = dma.vmem_to_hbm [thread:$0]  (%p696_p5), %s384_s7, 128, %s741_s11, %s366_s12   ;;  %vm363_vm4 = vcmask 7168  }
 0x1a1   : > { %s247_s9 = scalar_lea.vmem %s788_s5, %s716_s10 }
 0x21c   : > { %v348_v23 = vpop.xlane.xlu1 %347 }
 0x21d   : > { %557 = vlog2.f32 %v348_v23 }
 0x220   : > { %v360_v27 = vpop.xlane.xlu1 %359 }
 0x227   : > { %v558_v24 = vpop.eup %557 }
 0x228   : > { %v350_v25 = vmul.f32 0.6931472, %v558_v24 }
 0x22a   : > { %v361_v26 = vadd.f32 %v350_v25, %v342_v13 }
 0x22c   : > { %v362_v28 = vsub.f32 %v361_v26, %v360_v27 }
 0x22e   : > { %364 = vst.msk [vmem:[%s247_s9] sm:$0xff] %vm363_vm4, %v362_v28 }
 0x22f PF: > { %p517_p1 = scmp.ge.s32.totalorder %s621_s21, 2  ;;  %s398_s28 = sand.u32 1, %s609_s18  }
 0x230   : > { %s399_s7 = scalar_lea.sflag [#allocation3], %s398_s28 }
 0x231   : > { %p514_p5 = pnand %p517_p1, %p700_p6 }
 0x233   : > { %604 = dma.done.wait (!%p514_p5), %s399_s7, 128  }
 0x234   : > { %606 = vsyncadd (!%p514_p5), %s399_s7, 4294967168  ;;  %p16_p2 = scmp.ge.s32.totalorder %s683_s24, 4   ;;  %s791_s18 = smov %s613_s19 }
 0x235   : > { %s792_s19 = smov %s617_s20  ;;  %s793_s20 = smov %s694_s27 }
 0x236   : > { %s794_s21 = smov %s683_s24  ;;  %18 = sbr.rel (!%p16_p2) target bundleno = 3 (0x3), region = 86 }
 0x23d   :  { %411 = vsyncpa [#allocation3], 1 }
 0x23e   :  { %413 = vsyncpa [#allocation3 + $0x1], 1 }

</bundles_post_ra>
